<compile_context>
chip_gen: v6e
topology: v6e:2x2x1
jax: 0.10.0
libtpu: 0.0.40
codegen_flags: <defaults>
</compile_context>

<pallas_src>
import jax
import jax.numpy as jnp
from jax.experimental import pallas as pl
from jax.experimental.pallas import tpu as pltpu

DTYPE = jnp.float32
FP = 128   # lane-padded feature width (all hidden dims <= 32 -> pad to one full lane tile)
GP = 8     # sublane-padded graph count for the pooled output


def _vmem():
    return pl.BlockSpec(memory_space=pltpu.MemorySpace.VMEM)


# --------------------------- fused Pallas kernel -----------------------------

def gcn_reg_fused_kernel(x_ref, adj_ref, ahat_ref, pool_ref,
                         gat_w_ref, gat_att_ref, gat_b_ref,
                         gcn_w_ref, gcn_b_ref,
                         lin_w_ref, lin_b_ref,
                         o_ref):
    f32 = jnp.float32

    # ---- GATConv(input_dim, hidden) + tanh ----------------------------------
    h0 = jnp.dot(x_ref[...], gat_w_ref[...], preferred_element_type=f32)      # [N, FP]
    # both attention projections from one MXU push: col 0 = a_dst.h_i, col 1 = a_src.h_i
    att = jnp.dot(h0, gat_att_ref[...], preferred_element_type=f32)           # [N, FP]
    attT = att.T                                                              # [FP, N] (XLU)
    e = att[:, 0:1] + attT[1:2, :]                                            # [N, N] logits
    e = jnp.where(e >= 0.0, e, 0.2 * e)                                       # LeakyReLU(0.2)
    mask = adj_ref[...] > 0.5                                                 # neighbours + self loops
    e = jnp.where(mask, e, -1e30)
    e = e - jnp.max(e, axis=1, keepdims=True)                                 # softmax over sources
    p = jnp.exp(e) * mask.astype(f32)
    inv = pl.reciprocal(jnp.sum(p, axis=1, keepdims=True), approx=True)       # EUP, not VALU
    attn = p * inv
    h = jnp.tanh(jnp.dot(attn, h0, preferred_element_type=f32) + gat_b_ref[...])

    # ---- 3x GCNConv + tanh, h stays VMEM/vreg-resident -----------------------
    for i in range(3):                                                        # static unroll
        hm = jnp.dot(ahat_ref[...], h, preferred_element_type=f32)            # (Ahat @ X) first
        h = jnp.tanh(jnp.dot(hm, gcn_w_ref[i], preferred_element_type=f32)
                     + gcn_b_ref[i])

    # ---- scatter_mean pooling + final Linear ---------------------------------
    pooled = jnp.dot(pool_ref[...], h, preferred_element_type=f32)            # [GP, FP]
    out = jnp.dot(pooled, lin_w_ref[...], preferred_element_type=f32) + lin_b_ref[...]
    o_ref[...] = out.astype(o_ref.dtype)                                      # full 128-lane store


# --------------------------- wrapper ------------------------------------------

def gcn_reg_forward(prep, graph, x, n_graphs):
    n, f = x.shape
    xp = jnp.zeros((n, FP), DTYPE).at[:, :f].set(x)
    out = pl.pallas_call(
        gcn_reg_fused_kernel,
        out_shape=jax.ShapeDtypeStruct((GP, FP), DTYPE),
        in_specs=[_vmem()] * 11,
        out_specs=_vmem(),
    )(xp, graph["adj"], graph["ahat"], graph["pool"],
      prep["gat_w"], prep["gat_att"], prep["gat_b"],
      prep["gcn_w"], prep["gcn_b"],
      prep["lin_w"], prep["lin_b"])
    # PyTorch: linearx(x)[None, :][:og_size].squeeze(0) -> identity on [G, 3]
    return out[:n_graphs, :3]


# --------------------------- one-time prep (plain JAX) -------------------------

def _pad2(a, rows, cols):
    return jnp.zeros((rows, cols), DTYPE).at[:a.shape[0], :a.shape[1]].set(a.astype(DTYPE))


def prepare_params(params, hidden_dim):
    """Zero-pad every weight to lane-dense [*, 128] shapes (done once, not per forward)."""
    gat_att = jnp.zeros((FP, FP), DTYPE)
    gat_att = gat_att.at[:hidden_dim, 0].set(params["gat_adst"][:, 0])   # target-side vector
    gat_att = gat_att.at[:hidden_dim, 1].set(params["gat_asrc"][0, :])   # source-side vector
    return {
        "gat_w": _pad2(params["gat_w"], FP, FP),
        "gat_att": gat_att,
        "gat_b": _pad2(params["gat_b"], 1, FP),
        "gcn_w": jnp.stack([_pad2(params[f"gcn{i}_w"], FP, FP) for i in range(3)]),
        "gcn_b": jnp.stack([_pad2(params[f"gcn{i}_b"], 1, FP) for i in range(3)]),
        "lin_w": _pad2(params["lin_w"], FP, FP),
        "lin_b": _pad2(params["lin_b"], 1, FP),
    }


def build_gat_adj(edge_index, n):
    """adj[target, source] = 1 for every edge (plus self loops)."""
    src, dst = edge_index[0], edge_index[1]
    adj = jnp.zeros((n, n), DTYPE).at[dst, src].set(1.0)
    return adj.at[jnp.arange(n), jnp.arange(n)].set(1.0)


def build_gcn_ahat(edge_index, edge_weight, n):
    """Dense D^-1/2 (A_w + I) D^-1/2 with A_hat[target, source]=norm (PyG gcn_norm)."""
    src, dst = edge_index[0], edge_index[1]
    loop = jnp.arange(n)
    src_f = jnp.concatenate([src, loop])
    dst_f = jnp.concatenate([dst, loop])
    w_f = jnp.concatenate([edge_weight, jnp.ones((n,), DTYPE)])
    deg = jnp.zeros((n,), DTYPE).at[dst_f].add(w_f)
    dinv = jnp.where(deg > 0, 1.0 / jnp.sqrt(deg), 0.0)
    norm = dinv[src_f] * w_f * dinv[dst_f]
    return jnp.zeros((n, n), DTYPE).at[dst_f, src_f].add(norm)


def build_pool_matrix(batch, n_rows, n):
    """M[g, i] = 1/|V_g| if node i belongs to graph g (scatter_mean); padded rows are zero."""
    onehot = (batch[None, :] == jnp.arange(n_rows)[:, None]).astype(DTYPE)   # [n_rows, N]
    counts = jnp.maximum(onehot.sum(axis=1, keepdims=True), 1.0)
    return onehot / counts


def prepare_graph(edge_index, edge_weight, batch, n_nodes):
    """Static-graph structures, built once and reused across forwards."""
    return {
        "adj": build_gat_adj(edge_index, n_nodes),
        "ahat": build_gcn_ahat(edge_index, edge_weight, n_nodes),
        "pool": build_pool_matrix(batch, GP, n_nodes),
    }


# --------------------------- params & pure-JAX reference -----------------------

def init_params(key, input_dim, hidden_dim):
    dims = [input_dim, hidden_dim, 2 * hidden_dim, 3 * hidden_dim, 4 * hidden_dim]
    keys = jax.random.split(key, 16)
    p = {}
    p["gat_w"] = 0.2 * jax.random.normal(keys[0], (dims[0], dims[1]), DTYPE)
    p["gat_asrc"] = 0.2 * jax.random.normal(keys[1], (1, dims[1]), DTYPE)
    p["gat_adst"] = 0.2 * jax.random.normal(keys[2], (dims[1], 1), DTYPE)
    p["gat_b"] = jnp.zeros((1, dims[1]), DTYPE)
    for i in range(3):
        p[f"gcn{i}_w"] = 0.2 * jax.random.normal(keys[3 + i], (dims[1 + i], dims[2 + i]), DTYPE)
        p[f"gcn{i}_b"] = jnp.zeros((1, dims[2 + i]), DTYPE)
    p["lin_w"] = 0.2 * jax.random.normal(keys[10], (dims[4], 3), DTYPE)
    p["lin_b"] = 0.1 * jax.random.normal(keys[11], (1, 3), DTYPE)
    return p


def gcn_reg_reference(params, x, adj, ahat, pool, n_graphs):
    """Unpadded pure-JAX forward (f32, exact division) used as correctness reference."""
    h0 = x @ params["gat_w"]
    a_d = h0 @ params["gat_adst"]                 # [N, 1]
    a_s = (h0 @ params["gat_asrc"].T).T           # [1, N]
    e = a_d + a_s
    e = jnp.where(e >= 0.0, e, 0.2 * e)
    mask = adj > 0.5
    e = jnp.where(mask, e, -1e30)
    e = e - e.max(axis=1, keepdims=True)
    p = jnp.exp(e) * mask.astype(DTYPE)
    attn = p / p.sum(axis=1, keepdims=True)
    h = jnp.tanh(attn @ h0 + params["gat_b"])
    for i in range(3):
        h = jnp.tanh(ahat @ h @ params[f"gcn{i}_w"] + params[f"gcn{i}_b"])
    out = pool @ h @ params["lin_w"] + params["lin_b"]
    return out[:n_graphs]


# --------------------------- demo ----------------------------------------------

if __name__ == "__main__":
    input_dim = 8
    hidden_dim = 8          # amp_size
    n_nodes = 16            # 2 graphs of 8 nodes each
    n_graphs = 2            # = data.y.shape[0] (og_size)

    key = jax.random.PRNGKey(0)
    k_x, k_w, k_p = jax.random.split(key, 3)

    x = jax.random.normal(k_x, (n_nodes, input_dim), DTYPE)

    # two 8-node ring graphs, bidirectional edges
    src_list, dst_list = [], []
    for g in range(n_graphs):
        off = g * 8
        for i in range(8):
            a, b = off + i, off + (i + 1) % 8
            src_list += [a, b]
            dst_list += [b, a]
    edge_index = jnp.array([src_list, dst_list], dtype=jnp.int32)        # [2, E]
    n_edges = edge_index.shape[1]
    edge_weight = jax.random.uniform(k_w, (n_edges,), DTYPE, 0.5, 1.5)   # edge_attr.squeeze()
    batch = jnp.array([0] * 8 + [1] * 8, dtype=jnp.int32)

    params = init_params(k_p, input_dim, hidden_dim)
    prep = prepare_params(params, hidden_dim)
    graph = prepare_graph(edge_index, edge_weight, batch, n_nodes)

    out = gcn_reg_forward(prep, graph, x, n_graphs)
    out = jax.block_until_ready(out)

    assert out.shape == (n_graphs, 3), out.shape
    assert bool(jnp.all(jnp.isfinite(out)))

    # correctness vs. unpadded pure-JAX f32 reference (tolerance absorbs approx reciprocal)
    ref = gcn_reg_reference(params, x, graph["adj"], graph["ahat"], graph["pool"], n_graphs)
    err = float(jnp.max(jnp.abs(out - ref)))
    assert err < 3e-2, err

    print("KERNEL_OK")
</pallas_src>

<mosaic_0001>
module attributes {stable_mosaic.version = 11 : i64} {
  func.func @gcn_reg_fused_kernel(%arg0: memref<16x128xf32, #tpu.memory_space<vmem>>, %arg1: memref<16x16xf32, #tpu.memory_space<vmem>>, %arg2: memref<16x16xf32, #tpu.memory_space<vmem>>, %arg3: memref<8x16xf32, #tpu.memory_space<vmem>>, %arg4: memref<128x128xf32, #tpu.memory_space<vmem>>, %arg5: memref<128x128xf32, #tpu.memory_space<vmem>>, %arg6: memref<1x128xf32, #tpu.memory_space<vmem>>, %arg7: memref<3x128x128xf32, #tpu.memory_space<vmem>>, %arg8: memref<3x1x128xf32, #tpu.memory_space<vmem>>, %arg9: memref<128x128xf32, #tpu.memory_space<vmem>>, %arg10: memref<1x128xf32, #tpu.memory_space<vmem>>, %arg11: memref<8x128xf32, #tpu.memory_space<vmem>>) attributes {dimension_semantics = [], scalar_prefetch = 0 : i64, scratch_operands = 0 : i64, tpu.core_type = #tpu.core_type<tc>} {
    %c0 = arith.constant 0 : index
    %c0_0 = arith.constant 0 : index
    %0 = vector.load %arg0[%c0, %c0_0] : memref<16x128xf32, #tpu.memory_space<vmem>>, vector<16x128xf32>
    %c0_1 = arith.constant 0 : index
    %c0_2 = arith.constant 0 : index
    %1 = vector.load %arg4[%c0_1, %c0_2] : memref<128x128xf32, #tpu.memory_space<vmem>>, vector<128x128xf32>
    %cst = arith.constant dense<0.000000e+00> : vector<16x128xf32>
    %2 = tpu.matmul %0, %1, %cst {dimension_numbers = #tpu.dot_dimension_numbers<[1], [0], [0], [1], [0, 0, 1, 1], [], []>} : vector<16x128xf32>, vector<128x128xf32>, vector<16x128xf32> -> vector<16x128xf32>
    %c0_3 = arith.constant 0 : index
    %c0_4 = arith.constant 0 : index
    %3 = vector.load %arg5[%c0_3, %c0_4] : memref<128x128xf32, #tpu.memory_space<vmem>>, vector<128x128xf32>
    %cst_5 = arith.constant dense<0.000000e+00> : vector<16x128xf32>
    %4 = tpu.matmul %2, %3, %cst_5 {dimension_numbers = #tpu.dot_dimension_numbers<[1], [0], [0], [1], [0, 0, 1, 1], [], []>} : vector<16x128xf32>, vector<128x128xf32>, vector<16x128xf32> -> vector<16x128xf32>
    %5 = tpu.transpose %4, [1, 0] : vector<16x128xf32> -> vector<128x16xf32>
    %6 = vector.extract_strided_slice %4 {offsets = [0, 0], sizes = [16, 1], strides = [1, 1]} : vector<16x128xf32> to vector<16x1xf32>
    %7 = vector.extract_strided_slice %5 {offsets = [1, 0], sizes = [1, 16], strides = [1, 1]} : vector<128x16xf32> to vector<1x16xf32>
    %8 = vector.broadcast %6 : vector<16x1xf32> to vector<16x16xf32>
    %9 = vector.broadcast %7 : vector<1x16xf32> to vector<16x16xf32>
    %10 = arith.addf %8, %9 : vector<16x16xf32>
    %cst_6 = arith.constant 0.000000e+00 : f32
    %11 = vector.broadcast %cst_6 : f32 to vector<16x16xf32>
    %12 = arith.cmpf oge, %10, %11 : vector<16x16xf32>
    %cst_7 = arith.constant 2.000000e-01 : f32
    %13 = vector.broadcast %cst_7 : f32 to vector<16x16xf32>
    %14 = arith.mulf %13, %10 : vector<16x16xf32>
    %15 = arith.select %12, %10, %14 : vector<16x16xi1>, vector<16x16xf32>
    %c0_8 = arith.constant 0 : index
    %c0_9 = arith.constant 0 : index
    %16 = vector.load %arg1[%c0_8, %c0_9] : memref<16x16xf32, #tpu.memory_space<vmem>>, vector<16x16xf32>
    %cst_10 = arith.constant 5.000000e-01 : f32
    %17 = vector.broadcast %cst_10 : f32 to vector<16x16xf32>
    %18 = arith.cmpf ogt, %16, %17 : vector<16x16xf32>
    %cst_11 = arith.constant -1.000000e+30 : f32
    %19 = vector.broadcast %cst_11 : f32 to vector<16x16xf32>
    %20 = arith.select %18, %15, %19 : vector<16x16xi1>, vector<16x16xf32>
    %cst_12 = arith.constant dense<0xFF800000> : vector<16xf32>
    %21 = vector.multi_reduction <maximumf>, %20, %cst_12 [1] : vector<16x16xf32> to vector<16xf32>
    %22 = vector.shape_cast %21 : vector<16xf32> to vector<16x1xf32>
    %23 = vector.broadcast %22 : vector<16x1xf32> to vector<16x16xf32>
    %24 = arith.subf %20, %23 : vector<16x16xf32>
    %25 = math.exp %24 : vector<16x16xf32>
    %26 = arith.extui %18 : vector<16x16xi1> to vector<16x16xi32>
    %27 = arith.sitofp %26 : vector<16x16xi32> to vector<16x16xf32>
    %28 = arith.mulf %25, %27 : vector<16x16xf32>
    %cst_13 = arith.constant dense<0.000000e+00> : vector<16xf32>
    %29 = vector.multi_reduction <add>, %28, %cst_13 [1] : vector<16x16xf32> to vector<16xf32>
    %30 = vector.shape_cast %29 : vector<16xf32> to vector<16x1xf32>
    %31 = tpu.reciprocal %30 {approx = true} : vector<16x1xf32> -> vector<16x1xf32>
    %32 = vector.broadcast %31 : vector<16x1xf32> to vector<16x16xf32>
    %33 = arith.mulf %28, %32 : vector<16x16xf32>
    %cst_14 = arith.constant dense<0.000000e+00> : vector<16x128xf32>
    %34 = tpu.matmul %33, %2, %cst_14 {dimension_numbers = #tpu.dot_dimension_numbers<[1], [0], [0], [1], [0, 0, 1, 1], [], []>} : vector<16x16xf32>, vector<16x128xf32>, vector<16x128xf32> -> vector<16x128xf32>
    %c0_15 = arith.constant 0 : index
    %c0_16 = arith.constant 0 : index
    %35 = vector.load %arg6[%c0_15, %c0_16] : memref<1x128xf32, #tpu.memory_space<vmem>>, vector<1x128xf32>
    %36 = vector.broadcast %35 : vector<1x128xf32> to vector<16x128xf32>
    %37 = arith.addf %34, %36 : vector<16x128xf32>
    %38 = math.tanh %37 : vector<16x128xf32>
    %c0_17 = arith.constant 0 : index
    %c0_18 = arith.constant 0 : index
    %39 = vector.load %arg2[%c0_17, %c0_18] : memref<16x16xf32, #tpu.memory_space<vmem>>, vector<16x16xf32>
    %cst_19 = arith.constant dense<0.000000e+00> : vector<16x128xf32>
    %40 = tpu.matmul %39, %38, %cst_19 {dimension_numbers = #tpu.dot_dimension_numbers<[1], [0], [0], [1], [0, 0, 1, 1], [], []>} : vector<16x16xf32>, vector<16x128xf32>, vector<16x128xf32> -> vector<16x128xf32>
    %c0_20 = arith.constant 0 : index
    %c0_21 = arith.constant 0 : index
    %c0_22 = arith.constant 0 : index
    %41 = vector.load %arg7[%c0_20, %c0_21, %c0_22] : memref<3x128x128xf32, #tpu.memory_space<vmem>>, vector<1x128x128xf32>
    %42 = vector.shape_cast %41 : vector<1x128x128xf32> to vector<128x128xf32>
    %cst_23 = arith.constant dense<0.000000e+00> : vector<16x128xf32>
    %43 = tpu.matmul %40, %42, %cst_23 {dimension_numbers = #tpu.dot_dimension_numbers<[1], [0], [0], [1], [0, 0, 1, 1], [], []>} : vector<16x128xf32>, vector<128x128xf32>, vector<16x128xf32> -> vector<16x128xf32>
    %c0_24 = arith.constant 0 : index
    %c0_25 = arith.constant 0 : index
    %c0_26 = arith.constant 0 : index
    %44 = vector.load %arg8[%c0_24, %c0_25, %c0_26] : memref<3x1x128xf32, #tpu.memory_space<vmem>>, vector<1x1x128xf32>
    %45 = vector.shape_cast %44 : vector<1x1x128xf32> to vector<1x128xf32>
    %46 = vector.broadcast %45 : vector<1x128xf32> to vector<16x128xf32>
    %47 = arith.addf %43, %46 : vector<16x128xf32>
    %48 = math.tanh %47 : vector<16x128xf32>
    %c0_27 = arith.constant 0 : index
    %c0_28 = arith.constant 0 : index
    %49 = vector.load %arg2[%c0_27, %c0_28] : memref<16x16xf32, #tpu.memory_space<vmem>>, vector<16x16xf32>
    %cst_29 = arith.constant dense<0.000000e+00> : vector<16x128xf32>
    %50 = tpu.matmul %49, %48, %cst_29 {dimension_numbers = #tpu.dot_dimension_numbers<[1], [0], [0], [1], [0, 0, 1, 1], [], []>} : vector<16x16xf32>, vector<16x128xf32>, vector<16x128xf32> -> vector<16x128xf32>
    %c1 = arith.constant 1 : index
    %c0_30 = arith.constant 0 : index
    %c0_31 = arith.constant 0 : index
    %51 = vector.load %arg7[%c1, %c0_30, %c0_31] : memref<3x128x128xf32, #tpu.memory_space<vmem>>, vector<1x128x128xf32>
    %52 = vector.shape_cast %51 : vector<1x128x128xf32> to vector<128x128xf32>
    %cst_32 = arith.constant dense<0.000000e+00> : vector<16x128xf32>
    %53 = tpu.matmul %50, %52, %cst_32 {dimension_numbers = #tpu.dot_dimension_numbers<[1], [0], [0], [1], [0, 0, 1, 1], [], []>} : vector<16x128xf32>, vector<128x128xf32>, vector<16x128xf32> -> vector<16x128xf32>
    %c1_33 = arith.constant 1 : index
    %c0_34 = arith.constant 0 : index
    %c0_35 = arith.constant 0 : index
    %54 = vector.load %arg8[%c1_33, %c0_34, %c0_35] : memref<3x1x128xf32, #tpu.memory_space<vmem>>, vector<1x1x128xf32>
    %55 = vector.shape_cast %54 : vector<1x1x128xf32> to vector<1x128xf32>
    %56 = vector.broadcast %55 : vector<1x128xf32> to vector<16x128xf32>
    %57 = arith.addf %53, %56 : vector<16x128xf32>
    %58 = math.tanh %57 : vector<16x128xf32>
    %c0_36 = arith.constant 0 : index
    %c0_37 = arith.constant 0 : index
    %59 = vector.load %arg2[%c0_36, %c0_37] : memref<16x16xf32, #tpu.memory_space<vmem>>, vector<16x16xf32>
    %cst_38 = arith.constant dense<0.000000e+00> : vector<16x128xf32>
    %60 = tpu.matmul %59, %58, %cst_38 {dimension_numbers = #tpu.dot_dimension_numbers<[1], [0], [0], [1], [0, 0, 1, 1], [], []>} : vector<16x16xf32>, vector<16x128xf32>, vector<16x128xf32> -> vector<16x128xf32>
    %c2 = arith.constant 2 : index
    %c0_39 = arith.constant 0 : index
    %c0_40 = arith.constant 0 : index
    %61 = vector.load %arg7[%c2, %c0_39, %c0_40] : memref<3x128x128xf32, #tpu.memory_space<vmem>>, vector<1x128x128xf32>
    %62 = vector.shape_cast %61 : vector<1x128x128xf32> to vector<128x128xf32>
    %cst_41 = arith.constant dense<0.000000e+00> : vector<16x128xf32>
    %63 = tpu.matmul %60, %62, %cst_41 {dimension_numbers = #tpu.dot_dimension_numbers<[1], [0], [0], [1], [0, 0, 1, 1], [], []>} : vector<16x128xf32>, vector<128x128xf32>, vector<16x128xf32> -> vector<16x128xf32>
    %c2_42 = arith.constant 2 : index
    %c0_43 = arith.constant 0 : index
    %c0_44 = arith.constant 0 : index
    %64 = vector.load %arg8[%c2_42, %c0_43, %c0_44] : memref<3x1x128xf32, #tpu.memory_space<vmem>>, vector<1x1x128xf32>
    %65 = vector.shape_cast %64 : vector<1x1x128xf32> to vector<1x128xf32>
    %66 = vector.broadcast %65 : vector<1x128xf32> to vector<16x128xf32>
    %67 = arith.addf %63, %66 : vector<16x128xf32>
    %68 = math.tanh %67 : vector<16x128xf32>
    %c0_45 = arith.constant 0 : index
    %c0_46 = arith.constant 0 : index
    %69 = vector.load %arg3[%c0_45, %c0_46] : memref<8x16xf32, #tpu.memory_space<vmem>>, vector<8x16xf32>
    %cst_47 = arith.constant dense<0.000000e+00> : vector<8x128xf32>
    %70 = tpu.matmul %69, %68, %cst_47 {dimension_numbers = #tpu.dot_dimension_numbers<[1], [0], [0], [1], [0, 0, 1, 1], [], []>} : vector<8x16xf32>, vector<16x128xf32>, vector<8x128xf32> -> vector<8x128xf32>
    %c0_48 = arith.constant 0 : index
    %c0_49 = arith.constant 0 : index
    %71 = vector.load %arg9[%c0_48, %c0_49] : memref<128x128xf32, #tpu.memory_space<vmem>>, vector<128x128xf32>
    %cst_50 = arith.constant dense<0.000000e+00> : vector<8x128xf32>
    %72 = tpu.matmul %70, %71, %cst_50 {dimension_numbers = #tpu.dot_dimension_numbers<[1], [0], [0], [1], [0, 0, 1, 1], [], []>} : vector<8x128xf32>, vector<128x128xf32>, vector<8x128xf32> -> vector<8x128xf32>
    %c0_51 = arith.constant 0 : index
    %c0_52 = arith.constant 0 : index
    %73 = vector.load %arg10[%c0_51, %c0_52] : memref<1x128xf32, #tpu.memory_space<vmem>>, vector<1x128xf32>
    %74 = vector.broadcast %73 : vector<1x128xf32> to vector<8x128xf32>
    %75 = arith.addf %72, %74 : vector<8x128xf32>
    %c0_53 = arith.constant 0 : index
    %c0_54 = arith.constant 0 : index
    %76 = vector.load %arg11[%c0_53, %c0_54] : memref<8x128xf32, #tpu.memory_space<vmem>>, vector<8x128xf32>
    tpu.vector_store %arg11[%c0_53, %c0_54], %75 {strides = array<i32>} : memref<8x128xf32, #tpu.memory_space<vmem>>, vector<8x128xf32>,
    return
  }
}

</mosaic_0001>

<bundles_post_ra>
// kernel: tpu_custom_call.1
= control target key start
LH: loop header
LB: loop body
LE: loop exit
PB: predicated region body
PF: predicated region fallthrough
CT: control target
= control target key end

     0   :  { %16 = vsyncpa [#allocation3], 0  ;;  %s2041_s0 = inlined_call_operand.hbm [shape: f32[16,128], index: 0, kind: input, shape index: {}]   ;;  %s2042_s1 = inlined_call_operand.hbm [shape: f32[16,16], index: 1, kind: input, shape index: {}]   ;;  %s2043_s2 = inlined_call_operand.hbm [shape: f32[16,16], index: 2, kind: input, shape index: {}]   ;;  %s2044_s3 = inlined_call_operand.hbm [shape: f32[8,16], index: 3, kind: input, shape index: {}]   ;;  %s2045_s4 = inlined_call_operand.hbm [shape: f32[128,128], index: 4, kind: input, shape index: {}]   ;;  %s2046_s5 = inlined_call_operand.hbm [shape: f32[128,128], index: 5, kind: input, shape index: {}]   ;;  %s2047_s6 = inlined_call_operand.vmem [shape: f32[1,128], index: 6, kind: input, shape index: {}]   ;;  %s2048_s7 = inlined_call_operand.hbm [shape: f32[3,128,128], index: 7, kind: input, shape index: {}]   ;;  %s2049_s8 = inlined_call_operand.vmem [shape: f32[3,1,128], index: 8, kind: input, shape index: {}]   ;;  %s2050_s9 = inlined_call_operand.hbm [shape: f32[128,128], index: 9, kind: input, shape index: {}]   ;;  %s2051_s10 = inlined_call_operand.vmem [shape: f32[1,128], index: 10, kind: input, shape index: {}]   ;;  %s2052_s11 = inlined_call_operand.hbm [shape: f32[8,128], index: 11, kind: output, shape index: {}]  }
   0x1   :  { %17 = vsyncpa [#allocation6], 0 }
   0x2   :  { %18 = vsyncpa [#allocation9], 0 }
   0x3   :  { %19 = vsyncpa [#allocation12], 0 }
   0x4   :  { %20 = vsyncpa [#allocation15], 0 }
   0x5   :  { %21 = vsyncpa [#allocation4], 0  ;;  %s1853_s17 = smov [#allocation5]   ;;  %s1854_s19 = smov [#allocation8]  }
   0x6   :  { %s39_s18 = sshll.u32 %s1853_s17, 4  ;;  %s64_s20 = sshll.u32 %s1854_s19, 4  ;;  %s40_s18 = int_to_ptr.vmem [resolvable:$true] %s39_s18  ;;  %s65_s20 = int_to_ptr.vmem [resolvable:$true] %s64_s20 }
   0x7   :  { %s1669_s21 = scalar_lea.vmem %s40_s18, 256  ;;  %p1674_p1 = scmp.lt.s32.totalorder %s40_s18, %s40_s18 }
   0x8   :  { %p1670_p0 = scmp.ne.s32.totalorder %s40_s18, %s1669_s21  ;;  %p1675_p2 = scmp.lt.s32.totalorder %s1669_s21, %s1669_s21 }
   0xa   :  { %p1676_p3 = por %p1675_p2, %p1674_p1 }
   0xc   :  { %p1677_p4 = pnand %p1676_p3, %p1670_p0 }
   0xe   :  { %1680 = shalt.err (!%p1677_p4)
}
   0xf   :  { %s1855_s22 = smov 128   ;;  %s1856_s23 = smov 8  }
  0x10   :  { %45 = dma.hbm_to_vmem [thread:$0]  %s2042_s1, 256, %s40_s18, [#allocation6], %s1855_s22, %s1855_s22, %s1856_s23  }
  0x11   :  { %s1689_s26 = scalar_lea.vmem %s65_s20, 128  ;;  %p1694_p6 = scmp.lt.s32.totalorder %s65_s20, %s65_s20 }
  0x12   :  { %p1690_p5 = scmp.ne.s32.totalorder %s65_s20, %s1689_s26  ;;  %p1695_p7 = scmp.lt.s32.totalorder %s1689_s26, %s1689_s26 }
  0x14   :  { %p1696_p8 = por %p1695_p7, %p1694_p6 }
  0x16   :  { %p1697_p9 = pnand %p1696_p8, %p1690_p5 }
  0x18   :  { %1700 = shalt.err (!%p1697_p9)
}
  0x19   :  { %67 = dma.hbm_to_vmem [thread:$0]  %s2044_s3, 128, %s65_s20, [#allocation9]  }
  0x1a   :  { %s1857_s29 = smov [#allocation11]   ;;  %s1858_s12 = smov [#allocation2]  }
  0x1b   :  { %s85_s30 = sshll.u32 %s1857_s29, 4  ;;  %s27_s13 = sshll.u32 %s1858_s12, 4  ;;  %s86_s30 = int_to_ptr.vmem [resolvable:$true] %s85_s30  ;;  %s28_s13 = int_to_ptr.vmem [resolvable:$true] %s27_s13 }
  0x1c   :  { %s1709_s14 = scalar_lea.vmem %s86_s30, 2048  ;;  %p1714_p11 = scmp.lt.s32.totalorder %s86_s30, %s86_s30 }
  0x1d   :  { %p1710_p10 = scmp.ne.s32.totalorder %s86_s30, %s1709_s14  ;;  %p1715_p12 = scmp.lt.s32.totalorder %s1709_s14, %s1709_s14 }
  0x1f   :  { %p1716_p13 = por %p1715_p12, %p1714_p11 }
  0x21   :  { %p1717_p0 = pnand %p1716_p13, %p1710_p10 }
  0x23   :  { %1720 = shalt.err (!%p1717_p0)
}
  0x24   :  { %91 = dma.hbm_to_vmem [thread:$0]  %s2046_s5, 2048, %s86_s30, [#allocation12], %s1855_s22, %s1855_s22, %s1856_s23  }
  0x25   :  { %s1729_s3 = scalar_lea.vmem %s28_s13, 256  ;;  %p1734_p2 = scmp.lt.s32.totalorder %s28_s13, %s28_s13 }
  0x26   :  { %p1730_p1 = scmp.ne.s32.totalorder %s28_s13, %s1729_s3  ;;  %p1735_p3 = scmp.lt.s32.totalorder %s1729_s3, %s1729_s3 }
  0x28   :  { %p1736_p4 = por %p1735_p3, %p1734_p2 }
  0x2a   :  { %p1737_p5 = pnand %p1736_p4, %p1730_p1 }
  0x2c   :  { %1740 = shalt.err (!%p1737_p5)
}
  0x2d   :  { %33 = dma.hbm_to_vmem [thread:$0]  %s2041_s0, 256, %s28_s13, [#allocation3], %s1855_s22, %s1855_s22, %s1856_s23  }
  0x2e   :  { %s1859_s18 = smov [#allocation7]   ;;  %s1860_s20 = smov [#allocation10]  }
  0x2f   :  { %s51_s19 = sshll.u32 %s1859_s18, 4  ;;  %s73_s21 = sshll.u32 %s1860_s20, 4  ;;  %s52_s19 = int_to_ptr.vmem [resolvable:$true] %s51_s19  ;;  %s74_s21 = int_to_ptr.vmem [resolvable:$true] %s73_s21 }
  0x30   :  { %s1749_s5 = scalar_lea.vmem %s52_s19, 256  ;;  %p1754_p7 = scmp.lt.s32.totalorder %s52_s19, %s52_s19 }
  0x31   :  { %p1750_p6 = scmp.ne.s32.totalorder %s52_s19, %s1749_s5  ;;  %p1755_p8 = scmp.lt.s32.totalorder %s1749_s5, %s1749_s5 }
  0x33   :  { %p1756_p9 = por %p1755_p8, %p1754_p7 }
  0x35   :  { %p1757_p10 = pnand %p1756_p9, %p1750_p6 }
  0x37   :  { %1760 = shalt.err (!%p1757_p10)
}
  0x38   :  { %57 = dma.hbm_to_vmem [thread:$0]  %s2043_s2, 256, %s52_s19, [#allocation6], %s1855_s22, %s1855_s22, %s1856_s23  }
  0x39   :  { %s1769_s0 = scalar_lea.vmem %s74_s21, 2048  ;;  %p1774_p12 = scmp.lt.s32.totalorder %s74_s21, %s74_s21 }
  0x3a   :  { %p1770_p11 = scmp.ne.s32.totalorder %s74_s21, %s1769_s0  ;;  %p1775_p13 = scmp.lt.s32.totalorder %s1769_s0, %s1769_s0 }
  0x3c   :  { %p1776_p0 = por %p1775_p13, %p1774_p12 }
  0x3e   :  { %p1777_p1 = pnand %p1776_p0, %p1770_p11 }
  0x40   :  { %1780 = shalt.err (!%p1777_p1)
}
  0x41   :  { %79 = dma.hbm_to_vmem [thread:$0]  %s2045_s4, 2048, %s74_s21, [#allocation9], %s1855_s22, %s1855_s22, %s1856_s23  }
  0x42   :  { %s1861_s28 = smov [#allocation13]   ;;  %s1862_s30 = smov [#allocation14]  }
  0x43   :  { %s99_s29 = sshll.u32 %s1861_s28, 4  ;;  %s113_s12 = sshll.u32 %s1862_s30, 4  ;;  %s100_s29 = int_to_ptr.vmem [resolvable:$true] %s99_s29  ;;  %s114_s12 = int_to_ptr.vmem [resolvable:$true] %s113_s12 }
  0x44   :  { %s1789_s2 = scalar_lea.vmem %s100_s29, 6144  ;;  %p1794_p3 = scmp.lt.s32.totalorder %s100_s29, %s100_s29 }
  0x45   :  { %p1790_p2 = scmp.ne.s32.totalorder %s100_s29, %s1789_s2  ;;  %p1795_p4 = scmp.lt.s32.totalorder %s1789_s2, %s1789_s2 }
  0x47   :  { %p1796_p5 = por %p1795_p4, %p1794_p3 }
  0x49   :  { %p1797_p6 = pnand %p1796_p5, %p1790_p2 }
  0x4b   :  { %1800 = shalt.err (!%p1797_p6)
}
  0x4c   :  { %105 = dma.hbm_to_vmem [thread:$0]  %s2048_s7, 6144, %s100_s29, [#allocation12], %s1855_s22, %s1855_s22, %s1856_s23  }
  0x4d   :  { %s1809_s4 = scalar_lea.vmem %s114_s12, 2048  ;;  %p1814_p8 = scmp.lt.s32.totalorder %s114_s12, %s114_s12 }
  0x4e   :  { %p1810_p7 = scmp.ne.s32.totalorder %s114_s12, %s1809_s4  ;;  %p1815_p9 = scmp.lt.s32.totalorder %s1809_s4, %s1809_s4 }
  0x50   :  { %p1816_p10 = por %p1815_p9, %p1814_p8 }
  0x52   :  { %p1817_p11 = pnand %p1816_p10, %p1810_p7 }
  0x54   :  { %1820 = shalt.err (!%p1817_p11)
}
  0x55   :  { %119 = dma.hbm_to_vmem [thread:$0]  %s2050_s9, 2048, %s114_s12, [#allocation15], %s1855_s22, %s1855_s22, %s1856_s23  }
  0x56   :  { %1841 = dma.done.wait [#allocation3], 256  }
  0x57   :  { %1842 = vsyncadd [#allocation3], 4294967040 }
  0x58   :  { %1843 = dma.done.wait [#allocation6], 512  }
  0x59   :  { %1844 = vsyncadd [#allocation6], 4294966784 }
  0x5a   :  { %1845 = dma.done.wait [#allocation9], 2176  }
  0x5b   :  { %1846 = vsyncadd [#allocation9], 4294965120 }
  0x5c   :  { %1847 = dma.done.wait [#allocation12], 8192  }
  0x5d   :  { %1848 = vsyncadd [#allocation12], 4294959104 }
  0x5e   :  { %1849 = dma.done.wait [#allocation15], 2048  }
  0x5f   :  { %1850 = vsyncadd [#allocation15], 4294965248  ;;  %v163_v0 = vld [vmem:[#allocation10 + $0x78] sm:$0xff]  ;;  %v162_v1 = vld [vmem:[#allocation10 + $0x70] sm:$0xff]  ;;  %v1863_v36 = vmov 0   ;;  %v372_v39 = vlaneseq  ;;  %vm390_vm2 = vcmask 130048  }
  0x60   :  { %1377 = vmatprep.subr.mxu0 %v163_v0  ;;  %v161_v2 = vld [vmem:[#allocation10 + $0x68] sm:$0xff]  ;;  %v160_v3 = vld [vmem:[#allocation10 + $0x60] sm:$0xff]  ;;  %v159_v5 = vld [vmem:[#allocation10 + $0x58] sm:$0xff]  ;;  %1636 = vset.pattern.permute.xlu0 %v1863_v36  ;;  %vm1865_vm5 = vmmov 0   ;;  %s1866_s19 = smov [#allocation16]  }
  0x61   :  { %1378 = vmatpush3.msra.mxu0 %v163_v0  ;;  %v146_v4 = vld [vmem:[#allocation2] sm:$0xff]  ;;  %v254_v6 = vld [vmem:[#allocation11 + $0x78] sm:$0xff]  ;;  %v253_v7 = vld [vmem:[#allocation11 + $0x70] sm:$0xff]  ;;  %v373_v40 = vshrl.u32 %v372_v39, 7  ;;  %v1864_v0 = vmov 0.0   ;;  %s1220_s20 = sshll.u32 %s1866_s19, 4  ;;  %s1221_s20 = int_to_ptr.vmem [resolvable:$true] %s1220_s20 }
  0x62   :  { %1379 = vmatprep.subr.mxu0 %v162_v1  ;;  %1409 = vmatprep.mubr.f32.mxu0 %v146_v4  ;;  %v158_v8 = vld [vmem:[#allocation10 + $0x50] sm:$0xff]  ;;  %v252_v9 = vld [vmem:[#allocation11 + $0x68] sm:$0xff]  ;;  %v251_v11 = vld [vmem:[#allocation11 + $0x60] sm:$0xff]  ;;  %s1821_s21 = scalar_lea.vmem %s1221_s20, 128  ;;  %p1826_p13 = scmp.lt.s32.totalorder %s1221_s20, %s1221_s20 }
  0x63   :  { %1380 = vmatpush3.msra.mxu0 %v162_v1  ;;  %1412 = vmatprep.subr.mxu1 %v254_v6  ;;  %v157_v10 = vld [vmem:[#allocation10 + $0x48] sm:$0xff]  ;;  %v156_v12 = vld [vmem:[#allocation10 + $0x40] sm:$0xff]  ;;  %v250_v13 = vld [vmem:[#allocation11 + $0x58] sm:$0xff]  ;;  %v374_v41 = vsub.s32 1, %v373_v40  ;;  %p1822_p12 = scmp.ne.s32.totalorder %s1221_s20, %s1821_s21  ;;  %p1827_p0 = scmp.lt.s32.totalorder %s1821_s21, %s1821_s21 }
  0x64   :  { %1381 = vmatprep.subr.mxu0 %v161_v2  ;;  %1413 = vmatpush3.msra.mxu1 %v254_v6  ;;  %v155_v14 = vld [vmem:[#allocation10 + $0x38] sm:$0xff]  ;;  %v249_v15 = vld [vmem:[#allocation11 + $0x50] sm:$0xff]  ;;  %v248_v17 = vld [vmem:[#allocation11 + $0x48] sm:$0xff] }
  0x65   :  { %1382 = vmatpush3.msra.mxu0 %v161_v2  ;;  %1414 = vmatprep.subr.mxu1 %v253_v7  ;;  %v154_v16 = vld [vmem:[#allocation10 + $0x30] sm:$0xff]  ;;  %v153_v18 = vld [vmem:[#allocation10 + $0x28] sm:$0xff]  ;;  %v247_v19 = vld [vmem:[#allocation11 + $0x40] sm:$0xff]  ;;  %p1828_p1 = por %p1827_p0, %p1826_p13 }
  0x66   :  { %1383 = vmatprep.subr.mxu0 %v160_v3  ;;  %1415 = vmatpush3.msra.mxu1 %v253_v7  ;;  %v152_v20 = vld [vmem:[#allocation10 + $0x20] sm:$0xff]  ;;  %v246_v21 = vld [vmem:[#allocation11 + $0x38] sm:$0xff]  ;;  %v245_v23 = vld [vmem:[#allocation11 + $0x30] sm:$0xff] }
  0x67   :  { %1384 = vmatpush3.msra.mxu0 %v160_v3  ;;  %1416 = vmatprep.subr.mxu1 %v252_v9  ;;  %v151_v22 = vld [vmem:[#allocation10 + $0x18] sm:$0xff]  ;;  %v150_v24 = vld [vmem:[#allocation10 + $0x10] sm:$0xff]  ;;  %v244_v25 = vld [vmem:[#allocation11 + $0x28] sm:$0xff]  ;;  %p1829_p2 = pnand %p1828_p1, %p1822_p12 }
  0x68   :  { %1385 = vmatprep.subr.mxu0 %v159_v5  ;;  %1417 = vmatpush3.msra.mxu1 %v252_v9  ;;  %v149_v26 = vld [vmem:[#allocation10 + $0x8] sm:$0xff]  ;;  %v243_v27 = vld [vmem:[#allocation11 + $0x20] sm:$0xff]  ;;  %v242_v29 = vld [vmem:[#allocation11 + $0x18] sm:$0xff] }
  0x69   :  { %1386 = vmatpush3.msra.mxu0 %v159_v5  ;;  %1418 = vmatprep.subr.mxu1 %v251_v11  ;;  %v148_v28 = vld [vmem:[#allocation10] sm:$0xff]  ;;  %v147_v30 = vld [vmem:[#allocation2 + $0x8] sm:$0xff]  ;;  %v240_v32 = vld [vmem:[#allocation11 + $0x8] sm:$0xff] }
  0x6a   :  { %1387 = vmatprep.subr.mxu0 %v158_v8  ;;  %1419 = vmatpush3.msra.mxu1 %v251_v11  ;;  %v241_v31 = vld [vmem:[#allocation11 + $0x10] sm:$0xff]  ;;  %v239_v33 = vld [vmem:[#allocation11] sm:$0xff]  ;;  %v384_v45 = vld [vmem:[#allocation5] sm:$0xff] }
  0x6b   :  { %1388 = vmatpush3.msra.mxu0 %v158_v8  ;;  %1420 = vmatprep.subr.mxu1 %v250_v13  ;;  %v385_v48 = vld [vmem:[#allocation5 + $0x8] sm:$0xff]  ;;  %vm386_vm1 = vcmp.gt.f32.partialorder %v384_v45, 0.5 }
  0x6c   :  { %1389 = vmatprep.subr.mxu0 %v157_v10  ;;  %1421 = vmatpush3.msra.mxu1 %v250_v13  ;;  %vm387_vm4 = vcmp.gt.f32.partialorder %v385_v48, 0.5  ;;  %v1233_v1 = vsel %vm386_vm1, 1.0, %v1864_v0  ;;  %v592_v39 = vld [vmem:[#allocation13] sm:$0xff] }
  0x6d   :  { %1390 = vmatpush3.msra.mxu0 %v157_v10  ;;  %1422 = vmatprep.subr.mxu1 %v249_v15  ;;  %v1234_v3 = vsel %vm387_vm4, 1.0, %v1864_v0 }
  0x6e   :  { %1391 = vmatprep.subr.mxu0 %v156_v12  ;;  %1423 = vmatpush3.msra.mxu1 %v249_v15  ;;  %v1984_v15 = vld [vmem:[#allocation7] sm:$0xff] }
  0x6f   :  { %1392 = vmatpush3.msra.mxu0 %v156_v12  ;;  %1424 = vmatprep.subr.mxu1 %v248_v17 }
  0x70   :  { %1393 = vmatprep.subr.mxu0 %v155_v14  ;;  %1425 = vmatpush3.msra.mxu1 %v248_v17  ;;  %v606_v17 = vld [vmem:[#allocation13 + $0x70] sm:$0xff] }
  0x71   :  { %1394 = vmatpush3.msra.mxu0 %v155_v14  ;;  %1426 = vmatprep.subr.mxu1 %v247_v19 }
  0x72   :  { %1395 = vmatprep.subr.mxu0 %v154_v16  ;;  %1427 = vmatpush3.msra.mxu1 %v247_v19  ;;  %v604_v19 = vld [vmem:[#allocation13 + $0x60] sm:$0xff] }
  0x73   :  { %1396 = vmatpush3.msra.mxu0 %v154_v16  ;;  %1428 = vmatprep.subr.mxu1 %v246_v21  ;;  %v607_v16 = vld [vmem:[#allocation13 + $0x78] sm:$0xff] }
  0x74   :  { %1397 = vmatprep.subr.mxu0 %v153_v18  ;;  %1429 = vmatpush3.msra.mxu1 %v246_v21  ;;  %v602_v21 = vld [vmem:[#allocation13 + $0x50] sm:$0xff] }
  0x75   :  { %1398 = vmatpush3.msra.mxu0 %v153_v18  ;;  %1430 = vmatprep.subr.mxu1 %v245_v23  ;;  %v605_v18 = vld [vmem:[#allocation13 + $0x68] sm:$0xff] }
  0x76   :  { %1399 = vmatprep.subr.mxu0 %v152_v20  ;;  %1431 = vmatpush3.msra.mxu1 %v245_v23  ;;  %v600_v23 = vld [vmem:[#allocation13 + $0x40] sm:$0xff] }
  0x77   :  { %1400 = vmatpush3.msra.mxu0 %v152_v20  ;;  %1432 = vmatprep.subr.mxu1 %v244_v25  ;;  %v603_v20 = vld [vmem:[#allocation13 + $0x58] sm:$0xff] }
  0x78   :  { %1401 = vmatprep.subr.mxu0 %v151_v22  ;;  %1433 = vmatpush3.msra.mxu1 %v244_v25  ;;  %v598_v25 = vld [vmem:[#allocation13 + $0x30] sm:$0xff] }
  0x79   :  { %1402 = vmatpush3.msra.mxu0 %v151_v22  ;;  %1434 = vmatprep.subr.mxu1 %v243_v27  ;;  %v601_v22 = vld [vmem:[#allocation13 + $0x48] sm:$0xff] }
  0x7a   :  { %1403 = vmatprep.subr.mxu0 %v150_v24  ;;  %1435 = vmatpush3.msra.mxu1 %v243_v27  ;;  %v596_v27 = vld [vmem:[#allocation13 + $0x20] sm:$0xff] }
  0x7b   :  { %1404 = vmatpush3.msra.mxu0 %v150_v24  ;;  %1436 = vmatprep.subr.mxu1 %v242_v29  ;;  %v599_v24 = vld [vmem:[#allocation13 + $0x38] sm:$0xff] }
  0x7c   :  { %1405 = vmatprep.subr.mxu0 %v149_v26  ;;  %1437 = vmatpush3.msra.mxu1 %v242_v29  ;;  %v594_v29 = vld [vmem:[#allocation13 + $0x10] sm:$0xff] }
  0x7d   :  { %1406 = vmatpush3.msra.mxu0 %v149_v26  ;;  %1438 = vmatprep.subr.mxu1 %v241_v31  ;;  %v597_v26 = vld [vmem:[#allocation13 + $0x28] sm:$0xff] }
  0x7e   :  { %1407 = vmatprep.subr.mxu0 %v148_v28  ;;  %1439 = vmatpush3.msra.mxu1 %v241_v31 }
  0x7f   :  { %1408 = vmatpush3.msra.mxu0 %v148_v28  ;;  %1440 = vmatprep.subr.mxu1 %v240_v32  ;;  %v595_v28 = vld [vmem:[#allocation13 + $0x18] sm:$0xff] }
  0x80   :  { %1410 = vmatmul.mubr.f32.vlgmr.msra.gmra.mxu0 %v147_v30  ;;  %1441 = vmatpush3.msra.mxu1 %v240_v32  ;;  %v1235_v30 = vld [vmem:[%s2047_s6] ss:$0 sm:$0xff] }
  0x81   :  { %1442 = vmatprep.subr.mxu1 %v239_v33 }
  0x82   :  { %1443 = vmatpush3.msra.mxu1 %v239_v33 }
 0x140   :  { %v1411_v34 = vpop.f32.mrf.mxu0 }
 0x141   :  { %1447 = vmatprep.subr.mxu0 %v1411_v34 }
 0x142   :  { %v230_v35 = vpop.f32.mrf.mxu0  ;;  %1448 = vmatpush3.msra.mxu0 %v1411_v34 }
 0x143   :  { %1444 = vmatprep.mubr.f32.mxu1 %v230_v35  ;;  %1449 = vmatprep.subr.mxu0 %v230_v35 }
 0x144   :  { %1445 = vmatmul.mubr.f32.vlgmr.msra.gmra.mxu1 %v1411_v34  ;;  %1450 = vmatpush3.msra.mxu0 %v230_v35 }
 0x145   :  { %1458 = vmatprep.mubr.msk.f32.mxu1 %vm390_vm2, %v1984_v15  ;;  %1461 = vmatprep.subr.mxu0 %v607_v16 }
 0x204   :  { %v1446_v37 = vpop.f32.mrf.mxu1 }
 0x206   :  { %v321_v38 = vpop.f32.mrf.mxu1 }
 0x207   :  { %330 = vxpose.xlu1.b32.start [1/2] (short) (narrow) %v321_v38, 8  ;;  %364 = vperm.xlu0 %1636, %v321_v38   ;;  %v593_v38 = vld [vmem:[#allocation13 + $0x8] sm:$0xff] }
 0x20b   :  { %331 = vxpose.xlu1.b32.end [2/2] (short) (narrow) %v1446_v37, 8  ;;  %369 = vperm.xlu0 %1636, %v1446_v37   ;;  %v1991_v37 = vld [vmem:[#allocation7 + $0x8] sm:$0xff] }
 0x282   :  { %v365_v42 = vpop.permute.xlu0 %364 }
 0x283   :  { %v346_v43 = vpop.trf.xlu1 }
 0x284   :  { %v375_v44 = vrot.slane %v346_v43, %v374_v41 }
 0x286   :  { %v376_v46 = vadd.f32 %v375_v44, %v365_v42  ;;  %v370_v47 = vpop.permute.xlu0 %369  ;;  %v1240_v42 = vld [vmem:[%s2049_s8] ss:$0 sm:$0xff] }
 0x287   :  { %v377_v49 = vadd.f32 %v375_v44, %v370_v47 }
 0x288   :  { %vm378_vm0 = vcmp.ge.f32.partialorder %v376_v46, 0.0  ;;  %v380_v50 = vmul.f32 0.2, %v376_v46 }
 0x289   :  { %v381_v51 = vmul.f32 0.2, %v377_v49  ;;  %vm379_vm3 = vcmp.ge.f32.partialorder %v377_v49, 0.0 }
 0x28a   :  { %v382_v52 = vsel %vm378_vm0, %v376_v46, %v380_v50  ;;  %v782_v50 = vld [vmem:[#allocation13 + $0xf0] sm:$0xff] }
 0x28b   :  { %v388_v53 = vsel %vm386_vm1, %v382_v52, -1e+30  ;;  %v383_v54 = vsel %vm379_vm3, %v377_v49, %v381_v51  ;;  %v783_v49 = vld [vmem:[#allocation13 + $0xf8] sm:$0xff]  ;;  %v781_v51 = vld [vmem:[#allocation13 + $0xe8] sm:$0xff]  ;;  %v780_v52 = vld [vmem:[#allocation13 + $0xe0] sm:$0xff] }
 0x28c   :  { %v391_v55 = vsel %vm390_vm2, %v388_v53, -inf  ;;  %v389_v56 = vsel %vm387_vm4, %v383_v54, -1e+30  ;;  %v778_v54 = vld [vmem:[#allocation13 + $0xd0] sm:$0xff] }
 0x28d   :  { %392 = vmax.xlane.f32.xlu0 %v391_v55  ;;  %v394_v57 = vsel %vm390_vm2, %v389_v56, -inf  ;;  %v777_v55 = vld [vmem:[#allocation13 + $0xc8] sm:$0xff] }
 0x28e   :  { %395 = vmax.xlane.f32.xlu1 %v394_v57  ;;  %v775_v57 = vld [vmem:[#allocation13 + $0xb8] sm:$0xff] }
 0x316   :  { %v393_v58 = vpop.xlane.xlu0 %392 }
 0x317   :  { %v397_v59 = vsub.f32 %v388_v53, %v393_v58  ;;  %v396_v60 = vpop.xlane.xlu1 %395  ;;  %v779_v53 = vld [vmem:[#allocation13 + $0xd8] sm:$0xff]  ;;  %v774_v58 = vld [vmem:[#allocation13 + $0xb0] sm:$0xff] }
 0x318   :  { %v398_v61 = vsub.f32 %v389_v56, %v396_v60  ;;  %v776_v56 = vld [vmem:[#allocation13 + $0xc0] sm:$0xff] }
 0x319   :  { %v399_v62 = vmul.f32 1.442695, %v397_v59  ;;  %v773_v59 = vld [vmem:[#allocation13 + $0xa8] sm:$0xff]  ;;  %v772_v60 = vld [vmem:[#allocation13 + $0xa0] sm:$0xff] }
 0x31a   :  { %v401_v63 = vmul.f32 1.442695, %v398_v61  ;;  %v771_v61 = vld [vmem:[#allocation13 + $0x98] sm:$0xff] }
 0x31b   :  { %1637 = vpow2.f32 %v399_v62  ;;  %v770_v62 = vld [vmem:[#allocation13 + $0x90] sm:$0xff] }
 0x31c   :  { %1639 = vpow2.f32 %v401_v63  ;;  %v769_v63 = vld [vmem:[#allocation13 + $0x88] sm:$0xff] }
 0x328   :  { %v1638_v2 = vpop.eup %1637 }
 0x329   :  { %v1640_v4 = vpop.eup %1639  ;;  %v407_v5 = vmul.f32 %v1638_v2, %v1233_v1  ;;  %v768_v1 = vld [vmem:[#allocation13 + $0x80] sm:$0xff] }
 0x32a   :  { %v408_v7 = vmul.f32 %v1640_v4, %v1234_v3  ;;  %v1244_v4 = vld [vmem:[%s2049_s8 + $0x1] ss:$0 sm:$0xff] }
 0x32b   :  { %v409_v6 = vsel %vm390_vm2, %v407_v5, 0.0 }
 0x32c   :  { %410 = vadd.xlane.f32.xlu0 %v409_v6  ;;  %v412_v8 = vsel %vm390_vm2, %v408_v7, 0.0 }
 0x330   :  { %413 = vadd.xlane.f32.xlu0 %v412_v8 }
 0x3b5   :  { %v411_v9 = vpop.xlane.xlu0 %410 }
 0x3b6   :  { %1641 = vrcp.f32 %v411_v9 }
 0x3b9   :  { %v414_v10 = vpop.xlane.xlu0 %413 }
 0x3ba   :  { %1643 = vrcp.f32 %v414_v10 }
 0x3c3   :  { %v1642_v11 = vpop.eup %1641 }
 0x3c4   :  { %v417_v12 = vmul.f32 %v1642_v11, %v407_v5  ;;  %v960_v11 = vld [vmem:[#allocation13 + $0x178] sm:$0xff] }
 0x3c6   :  { %1451 = vmatprep.mubr.msk.f32.mxu0 %vm390_vm2, %v417_v12  ;;  %v959_v12 = vld [vmem:[#allocation13 + $0x170] sm:$0xff] }
 0x3c7   :  { %v1644_v13 = vpop.eup %1643 }
 0x3c8   :  { %v418_v14 = vmul.f32 %v1644_v13, %v408_v7  ;;  %v958_v13 = vld [vmem:[#allocation13 + $0x168] sm:$0xff] }
 0x3ca   :  { %1452 = vmatmul.mubr.msk.f32.vlgmr.msra.gmra.mxu0 %vm390_vm2, %v418_v14  ;;  %v957_v14 = vld [vmem:[#allocation13 + $0x160] sm:$0xff] }
 0x3cb   :  { %1462 = vmatpush3.msra.mxu0 %v607_v16  ;;  %v955_v16 = vld [vmem:[#allocation13 + $0x150] sm:$0xff] }
 0x3cc   :  { %1463 = vmatprep.subr.mxu0 %v606_v17 }
 0x3cd   :  { %1464 = vmatpush3.msra.mxu0 %v606_v17  ;;  %v954_v17 = vld [vmem:[#allocation13 + $0x148] sm:$0xff] }
 0x3ce   :  { %1465 = vmatprep.subr.mxu0 %v605_v18 }
 0x3cf   :  { %1466 = vmatpush3.msra.mxu0 %v605_v18  ;;  %v953_v18 = vld [vmem:[#allocation13 + $0x140] sm:$0xff] }
 0x3d0   :  { %1467 = vmatprep.subr.mxu0 %v604_v19 }
 0x3d1   :  { %1468 = vmatpush3.msra.mxu0 %v604_v19  ;;  %v952_v19 = vld [vmem:[#allocation13 + $0x138] sm:$0xff] }
 0x3d2   :  { %1469 = vmatprep.subr.mxu0 %v603_v20 }
 0x3d3   :  { %1470 = vmatpush3.msra.mxu0 %v603_v20  ;;  %v951_v20 = vld [vmem:[#allocation13 + $0x130] sm:$0xff] }
 0x3d4   :  { %1471 = vmatprep.subr.mxu0 %v602_v21 }
 0x3d5   :  { %1472 = vmatpush3.msra.mxu0 %v602_v21  ;;  %v950_v21 = vld [vmem:[#allocation13 + $0x128] sm:$0xff] }
 0x3d6   :  { %1473 = vmatprep.subr.mxu0 %v601_v22 }
 0x3d7   :  { %1474 = vmatpush3.msra.mxu0 %v601_v22  ;;  %v949_v22 = vld [vmem:[#allocation13 + $0x120] sm:$0xff] }
 0x3d8   :  { %1475 = vmatprep.subr.mxu0 %v600_v23 }
 0x3d9   :  { %1476 = vmatpush3.msra.mxu0 %v600_v23  ;;  %v948_v23 = vld [vmem:[#allocation13 + $0x118] sm:$0xff] }
 0x3da   :  { %1477 = vmatprep.subr.mxu0 %v599_v24 }
 0x3db   :  { %1478 = vmatpush3.msra.mxu0 %v599_v24  ;;  %v947_v24 = vld [vmem:[#allocation13 + $0x110] sm:$0xff] }
 0x3dc   :  { %1479 = vmatprep.subr.mxu0 %v598_v25 }
 0x3dd   :  { %1480 = vmatpush3.msra.mxu0 %v598_v25  ;;  %v946_v25 = vld [vmem:[#allocation13 + $0x108] sm:$0xff] }
 0x3de   :  { %1481 = vmatprep.subr.mxu0 %v597_v26 }
 0x3df   :  { %1482 = vmatpush3.msra.mxu0 %v597_v26  ;;  %v945_v26 = vld [vmem:[#allocation13 + $0x100] sm:$0xff] }
 0x3e0   :  { %1483 = vmatprep.subr.mxu0 %v596_v27 }
 0x3e1   :  { %1484 = vmatpush3.msra.mxu0 %v596_v27 }
 0x3e2   :  { %1485 = vmatprep.subr.mxu0 %v595_v28 }
 0x3e3   :  { %1486 = vmatpush3.msra.mxu0 %v595_v28 }
 0x3e4   :  { %1487 = vmatprep.subr.mxu0 %v594_v29 }
 0x3e5   :  { %1488 = vmatpush3.msra.mxu0 %v594_v29  ;;  %v1248_v29 = vld [vmem:[%s2049_s8 + $0x2] ss:$0 sm:$0xff] }
 0x3e6   :  { %1489 = vmatprep.subr.mxu0 %v593_v38 }
 0x3e7   :  { %1490 = vmatpush3.msra.mxu0 %v593_v38  ;;  %v1134_v38 = vld [vmem:[#allocation14 + $0x70] sm:$0xff] }
 0x3e8   :  { %1491 = vmatprep.subr.mxu0 %v592_v39 }
 0x3e9   :  { %1492 = vmatpush3.msra.mxu0 %v592_v39  ;;  %v1133_v39 = vld [vmem:[#allocation14 + $0x68] sm:$0xff] }
 0x48a   :  { %v1453_v31 = vpop.f32.mrf.mxu0 }
 0x48b   :  { %v504_v32 = vadd.f32 %v1453_v31, %v1235_v30 }
 0x48c   :  { %v498_v33 = vpop.f32.mrf.mxu0 }
 0x48d   :  { %1645 = vtanh.f32 %v504_v32  ;;  %v499_v34 = vadd.f32 %v1235_v30, %v498_v33 }
 0x48f   :  { %1647 = vtanh.f32 %v499_v34 }
 0x49a   :  { %v1646_v35 = vpop.eup %1645 }
 0x49b   :  { %1454 = vmatprep.subr.mxu1 %v1646_v35 }
 0x49c   :  { %v1648_v36 = vpop.eup %1647  ;;  %1455 = vmatpush3.msra.mxu1 %v1646_v35  ;;  %v1046_v35 = vld [vmem:[#allocation8] sm:$0xff] }
 0x49d   :  { %1456 = vmatprep.subr.mxu1 %v1648_v36 }
 0x49e   :  { %1457 = vmatpush3.msra.mxu1 %v1648_v36 }
 0x49f   :  { %1459 = vmatmul.mubr.msk.f32.vlgmr.msra.gmra.mxu1 %vm390_vm2, %v1991_v37 }
 0x4a0   :  { %1500 = vmatprep.mubr.msk.f32.mxu1 %vm390_vm2, %v1984_v15 }
 0x55f   :  { %v1460_v40 = vpop.f32.mrf.mxu1 }
 0x561   :  { %v583_v41 = vpop.f32.mrf.mxu1 }
 0x562   :  { %1493 = vmatprep.mubr.f32.mxu0 %v583_v41  ;;  %v1131_v41 = vld [vmem:[#allocation14 + $0x58] sm:$0xff] }
 0x563   :  { %1494 = vmatmul.mubr.f32.vlgmr.msra.gmra.mxu0 %v1460_v40  ;;  %v1132_v40 = vld [vmem:[#allocation14 + $0x60] sm:$0xff] }
 0x564   :  { %1542 = vmatprep.mubr.msk.f32.mxu0 %vm390_vm2, %v1984_v15  ;;  %v956_v15 = vld [vmem:[#allocation13 + $0x158] sm:$0xff] }
 0x623   :  { %v1495_v43 = vpop.f32.mrf.mxu0 }
 0x624   :  { %v687_v44 = vadd.f32 %v1495_v43, %v1240_v42  ;;  %v1129_v43 = vld [vmem:[#allocation14 + $0x48] sm:$0xff] }
 0x625   :  { %v681_v45 = vpop.f32.mrf.mxu0 }
 0x626   :  { %1649 = vtanh.f32 %v687_v44  ;;  %v682_v46 = vadd.f32 %v1240_v42, %v681_v45  ;;  %v1130_v42 = vld [vmem:[#allocation14 + $0x50] sm:$0xff]  ;;  %v1128_v44 = vld [vmem:[#allocation14 + $0x40] sm:$0xff]  ;;  %v1127_v45 = vld [vmem:[#allocation14 + $0x38] sm:$0xff] }
 0x628   :  { %1651 = vtanh.f32 %v682_v46  ;;  %v1126_v46 = vld [vmem:[#allocation14 + $0x30] sm:$0xff] }
 0x633   :  { %v1650_v47 = vpop.eup %1649 }
 0x634   :  { %1496 = vmatprep.subr.mxu1 %v1650_v47 }
 0x635   :  { %v1652_v48 = vpop.eup %1651  ;;  %1497 = vmatpush3.msra.mxu1 %v1650_v47  ;;  %v1125_v47 = vld [vmem:[#allocation14 + $0x28] sm:$0xff] }
 0x636   :  { %1498 = vmatprep.subr.mxu1 %v1652_v48 }
 0x637   :  { %1499 = vmatpush3.msra.mxu1 %v1652_v48  ;;  %v1124_v48 = vld [vmem:[#allocation14 + $0x20] sm:$0xff] }
 0x638   :  { %1501 = vmatmul.mubr.msk.f32.vlgmr.msra.gmra.mxu1 %vm390_vm2, %v1991_v37  ;;  %1503 = vmatprep.subr.mxu1 %v783_v49 }
 0x639   :  { %1504 = vmatpush3.msra.mxu1 %v783_v49  ;;  %v1123_v49 = vld [vmem:[#allocation14 + $0x18] sm:$0xff] }
 0x63a   :  { %1505 = vmatprep.subr.mxu1 %v782_v50 }
 0x63b   :  { %1506 = vmatpush3.msra.mxu1 %v782_v50  ;;  %v1122_v50 = vld [vmem:[#allocation14 + $0x10] sm:$0xff] }
 0x63c   :  { %1507 = vmatprep.subr.mxu1 %v781_v51 }
 0x63d   :  { %1508 = vmatpush3.msra.mxu1 %v781_v51  ;;  %v1121_v51 = vld [vmem:[#allocation14 + $0x8] sm:$0xff] }
 0x63e   :  { %1509 = vmatprep.subr.mxu1 %v780_v52 }
 0x63f   :  { %1510 = vmatpush3.msra.mxu1 %v780_v52  ;;  %v1120_v52 = vld [vmem:[#allocation14] sm:$0xff] }
 0x640   :  { %1511 = vmatprep.subr.mxu1 %v779_v53 }
 0x641   :  { %1512 = vmatpush3.msra.mxu1 %v779_v53 }
 0x642   :  { %1513 = vmatprep.subr.mxu1 %v778_v54 }
 0x643   :  { %1514 = vmatpush3.msra.mxu1 %v778_v54 }
 0x644   :  { %1515 = vmatprep.subr.mxu1 %v777_v55 }
 0x645   :  { %1516 = vmatpush3.msra.mxu1 %v777_v55  ;;  %v1250_v55 = vld [vmem:[%s2051_s10] ss:$0 sm:$0xff] }
 0x646   :  { %1517 = vmatprep.subr.mxu1 %v776_v56 }
 0x647   :  { %1518 = vmatpush3.msra.mxu1 %v776_v56 }
 0x648   :  { %1519 = vmatprep.subr.mxu1 %v775_v57 }
 0x649   :  { %1520 = vmatpush3.msra.mxu1 %v775_v57 }
 0x64a   :  { %1521 = vmatprep.subr.mxu1 %v774_v58 }
 0x64b   :  { %1522 = vmatpush3.msra.mxu1 %v774_v58 }
 0x64c   :  { %1523 = vmatprep.subr.mxu1 %v773_v59 }
 0x64d   :  { %1524 = vmatpush3.msra.mxu1 %v773_v59 }
 0x64e   :  { %1525 = vmatprep.subr.mxu1 %v772_v60 }
 0x64f   :  { %1526 = vmatpush3.msra.mxu1 %v772_v60 }
 0x650   :  { %1527 = vmatprep.subr.mxu1 %v771_v61 }
 0x651   :  { %1528 = vmatpush3.msra.mxu1 %v771_v61 }
 0x652   :  { %1529 = vmatprep.subr.mxu1 %v770_v62 }
 0x653   :  { %1530 = vmatpush3.msra.mxu1 %v770_v62 }
 0x654   :  { %1531 = vmatprep.subr.mxu1 %v769_v63 }
 0x655   :  { %1532 = vmatpush3.msra.mxu1 %v769_v63 }
 0x656   :  { %1533 = vmatprep.subr.mxu1 %v768_v1 }
 0x657   :  { %1534 = vmatpush3.msra.mxu1 %v768_v1 }
 0x658   :  { %1580 = vmatprep.subr.mxu1 %v1864_v0 }
 0x6f8   :  { %v1502_v2 = vpop.f32.mrf.mxu1 }
 0x6fa   :  { %v758_v3 = vpop.f32.mrf.mxu1 }
 0x6fb   :  { %1535 = vmatprep.mubr.f32.mxu1 %v758_v3 }
 0x6fc   :  { %1536 = vmatmul.mubr.f32.vlgmr.msra.gmra.mxu1 %v1502_v2 }
 0x6fd   :  { %1584 = vmatprep.mubr.msk.f32.mxu1 %vm1865_vm5, %v1864_v0 }
 0x7bc   :  { %v1537_v5 = vpop.f32.mrf.mxu1 }
 0x7bd   :  { %v864_v6 = vadd.f32 %v1537_v5, %v1244_v4 }
 0x7be   :  { %v858_v7 = vpop.f32.mrf.mxu1 }
 0x7bf   :  { %1653 = vtanh.f32 %v864_v6  ;;  %v859_v8 = vadd.f32 %v1244_v4, %v858_v7 }
 0x7c1   :  { %1655 = vtanh.f32 %v859_v8 }
 0x7cc   :  { %v1654_v9 = vpop.eup %1653 }
 0x7cd   :  { %1538 = vmatprep.subr.mxu0 %v1654_v9 }
 0x7ce   :  { %v1656_v10 = vpop.eup %1655  ;;  %1539 = vmatpush3.msra.mxu0 %v1654_v9 }
 0x7cf   :  { %1540 = vmatprep.subr.mxu0 %v1656_v10 }
 0x7d0   :  { %1541 = vmatpush3.msra.mxu0 %v1656_v10 }
 0x7d1   :  { %1543 = vmatmul.mubr.msk.f32.vlgmr.msra.gmra.mxu0 %vm390_vm2, %v1991_v37  ;;  %1545 = vmatprep.subr.mxu0 %v960_v11  ;;  %v1135_v37 = vld [vmem:[#allocation14 + $0x78] sm:$0xff] }
 0x7d2   :  { %1546 = vmatpush3.msra.mxu0 %v960_v11 }
 0x7d3   :  { %1547 = vmatprep.subr.mxu0 %v959_v12 }
 0x7d4   :  { %1548 = vmatpush3.msra.mxu0 %v959_v12 }
 0x7d5   :  { %1549 = vmatprep.subr.mxu0 %v958_v13 }
 0x7d6   :  { %1550 = vmatpush3.msra.mxu0 %v958_v13 }
 0x7d7   :  { %1551 = vmatprep.subr.mxu0 %v957_v14 }
 0x7d8   :  { %1552 = vmatpush3.msra.mxu0 %v957_v14 }
 0x7d9   :  { %1553 = vmatprep.subr.mxu0 %v956_v15 }
 0x7da   :  { %1554 = vmatpush3.msra.mxu0 %v956_v15 }
 0x7db   :  { %1555 = vmatprep.subr.mxu0 %v955_v16 }
 0x7dc   :  { %1556 = vmatpush3.msra.mxu0 %v955_v16 }
 0x7dd   :  { %1557 = vmatprep.subr.mxu0 %v954_v17 }
 0x7de   :  { %1558 = vmatpush3.msra.mxu0 %v954_v17 }
 0x7df   :  { %1559 = vmatprep.subr.mxu0 %v953_v18 }
 0x7e0   :  { %1560 = vmatpush3.msra.mxu0 %v953_v18 }
 0x7e1   :  { %1561 = vmatprep.subr.mxu0 %v952_v19 }
 0x7e2   :  { %1562 = vmatpush3.msra.mxu0 %v952_v19 }
 0x7e3   :  { %1563 = vmatprep.subr.mxu0 %v951_v20 }
 0x7e4   :  { %1564 = vmatpush3.msra.mxu0 %v951_v20 }
 0x7e5   :  { %1565 = vmatprep.subr.mxu0 %v950_v21 }
 0x7e6   :  { %1566 = vmatpush3.msra.mxu0 %v950_v21 }
 0x7e7   :  { %1567 = vmatprep.subr.mxu0 %v949_v22 }
 0x7e8   :  { %1568 = vmatpush3.msra.mxu0 %v949_v22 }
 0x7e9   :  { %1569 = vmatprep.subr.mxu0 %v948_v23 }
 0x7ea   :  { %1570 = vmatpush3.msra.mxu0 %v948_v23 }
 0x7eb   :  { %1571 = vmatprep.subr.mxu0 %v947_v24 }
 0x7ec   :  { %1572 = vmatpush3.msra.mxu0 %v947_v24 }
 0x7ed   :  { %1573 = vmatprep.subr.mxu0 %v946_v25 }
 0x7ee   :  { %1574 = vmatpush3.msra.mxu0 %v946_v25 }
 0x7ef   :  { %1575 = vmatprep.subr.mxu0 %v945_v26 }
 0x7f0   :  { %1576 = vmatpush3.msra.mxu0 %v945_v26 }
 0x891   :  { %v1544_v27 = vpop.f32.mrf.mxu0 }
 0x893   :  { %v935_v28 = vpop.f32.mrf.mxu0 }
 0x894   :  { %1577 = vmatprep.mubr.f32.mxu0 %v935_v28 }
 0x895   :  { %1578 = vmatmul.mubr.f32.vlgmr.msra.gmra.mxu0 %v1544_v27 }
 0x955   :  { %v1579_v30 = vpop.f32.mrf.mxu0 }
 0x956   :  { %v1041_v31 = vadd.f32 %v1579_v30, %v1248_v29 }
 0x957   :  { %v1035_v32 = vpop.f32.mrf.mxu0 }
 0x958   :  { %1657 = vtanh.f32 %v1041_v31  ;;  %v1036_v33 = vadd.f32 %v1248_v29, %v1035_v32 }
 0x95a   :  { %1659 = vtanh.f32 %v1036_v33 }
 0x965   :  { %v1658_v34 = vpop.eup %1657 }
 0x966   :  { %1581 = vmatpush3.msra.mxu1 %v1658_v34 }
 0x967   :  { %v1660_v36 = vpop.eup %1659  ;;  %1582 = vmatprep.subr.mxu1 %v1864_v0 }
 0x968   :  { %1583 = vmatpush3.msra.mxu1 %v1660_v36 }
 0x969   :  { %1585 = vmatmul.mubr.msk.f32.vlgmr.msra.gmra.mxu1 %vm390_vm2, %v1046_v35  ;;  %1587 = vmatprep.subr.mxu1 %v1864_v0 }
 0x96a   :  { %1588 = vmatpush3.msra.mxu1 %v1135_v37  ;;  %1619 = vmatprep.mubr.msk.f32.mxu1 %vm1865_vm5, %v1864_v0 }
 0x96b   :  { %1589 = vmatprep.subr.mxu1 %v1864_v0 }
 0x96c   :  { %1590 = vmatpush3.msra.mxu1 %v1134_v38 }
 0x96d   :  { %1591 = vmatprep.subr.mxu1 %v1864_v0 }
 0x96e   :  { %1592 = vmatpush3.msra.mxu1 %v1133_v39 }
 0x96f   :  { %1593 = vmatprep.subr.mxu1 %v1864_v0 }
 0x970   :  { %1594 = vmatpush3.msra.mxu1 %v1132_v40 }
 0x971   :  { %1595 = vmatprep.subr.mxu1 %v1864_v0 }
 0x972   :  { %1596 = vmatpush3.msra.mxu1 %v1131_v41 }
 0x973   :  { %1597 = vmatprep.subr.mxu1 %v1864_v0 }
 0x974   :  { %1598 = vmatpush3.msra.mxu1 %v1130_v42 }
 0x975   :  { %1599 = vmatprep.subr.mxu1 %v1864_v0 }
 0x976   :  { %1600 = vmatpush3.msra.mxu1 %v1129_v43 }
 0x977   :  { %1601 = vmatprep.subr.mxu1 %v1864_v0 }
 0x978   :  { %1602 = vmatpush3.msra.mxu1 %v1128_v44 }
 0x979   :  { %1603 = vmatprep.subr.mxu1 %v1864_v0 }
 0x97a   :  { %1604 = vmatpush3.msra.mxu1 %v1127_v45 }
 0x97b   :  { %1605 = vmatprep.subr.mxu1 %v1864_v0 }
 0x97c   :  { %1606 = vmatpush3.msra.mxu1 %v1126_v46 }
 0x97d   :  { %1607 = vmatprep.subr.mxu1 %v1864_v0 }
 0x97e   :  { %1608 = vmatpush3.msra.mxu1 %v1125_v47 }
 0x97f   :  { %1609 = vmatprep.subr.mxu1 %v1864_v0 }
 0x980   :  { %1610 = vmatpush3.msra.mxu1 %v1124_v48 }
 0x981   :  { %1611 = vmatprep.subr.mxu1 %v1864_v0 }
 0x982   :  { %1612 = vmatpush3.msra.mxu1 %v1123_v49 }
 0x983   :  { %1613 = vmatprep.subr.mxu1 %v1864_v0 }
 0x984   :  { %1614 = vmatpush3.msra.mxu1 %v1122_v50 }
 0x985   :  { %1615 = vmatprep.subr.mxu1 %v1864_v0 }
 0x986   :  { %1616 = vmatpush3.msra.mxu1 %v1121_v51 }
 0x987   :  { %1617 = vmatprep.subr.mxu1 %v1864_v0 }
 0x988   :  { %1618 = vmatpush3.msra.mxu1 %v1120_v52 }
 0xa29   :  { %v1116_v53 = vpop.f32.mrf.mxu1 }
 0xa2a   :  { %1620 = vmatmul.mubr.f32.vlgmr.msra.gmra.mxu1 %v1116_v53 }
 0xa2b   :  { %v1586_v54 = vpop.f32.mrf.mxu1 }
 0xaea   :  { %v1209_v56 = vpop.f32.mrf.mxu1 }
 0xaeb   :  { %v1210_v57 = vadd.f32 %v1250_v55, %v1209_v56 }
 0xaec   :  { %v1621_v58 = vpop.f32.mrf.mxu1 }
 0xaed   :  { %1213 = vst [vmem:[#allocation16] sm:$0xff] %v1210_v57 }
 0xaee   :  { %1832 = shalt.err (!%p1829_p2)
}
 0xaef   :  { %1223 = dma.vmem_to_hbm [thread:$0]  %s1221_s20, 128, %s2052_s11, [#allocation4]  }
 0xaf0   :  { %1851 = dma.done.wait [#allocation4], 128  }
 0xaf1   :  { %1852 = vsyncadd [#allocation4], 4294967168 }
 0xaf2   :  { %1227 = vsyncpa [#allocation3], 1 }
 0xaf3   :  { %1228 = vsyncpa [#allocation6], 1 }
 0xaf4   :  { %1229 = vsyncpa [#allocation9], 1 }
 0xaf5   :  { %1230 = vsyncpa [#allocation12], 1 }
 0xaf6   :  { %1231 = vsyncpa [#allocation15], 1 }
 0xaf7   :  { %1232 = vsyncpa [#allocation4], 1 }

</bundles_post_ra>
